<compile_context>
chip_gen: v7x
topology: tpu7x:2x2x1
jax: 0.10.0
libtpu: 0.0.40
codegen_flags: <defaults>
</compile_context>

<pallas_src>
from typing import List, Optional, Tuple

import jax
import jax.numpy as jnp
from jax.experimental import pallas as pl
from jax.experimental.pallas import tpu as pltpu


_TARGET_BLOCK_BYTES = 2 * 1024 * 1024  # aim for ~1-4 MiB output blocks


def _broadcast_query_kernel(q_ref, o_ref):
    # q_ref : (hb, WC)      lane-dense query tile (resident across batch steps)
    # o_ref : (bb, hb, WC)  output block covering bb leading-batch elements
    q = q_ref[...]
    for b in range(o_ref.shape[0]):   # bb is static -> unrolled stores
        o_ref[b] = q


def _pick_blocks(n: int, H: int, WC: int, itemsize: int) -> Tuple[int, int]:
    """Pick (batch_block bb, row_block hb) for output blocks of ~_TARGET bytes."""
    elem_bytes = WC * itemsize
    row_bytes = H * elem_bytes

    # Tile H only when one (H, WC) tile is too big AND the (8,128) rule stays
    # satisfiable for partial blocks; otherwise use the full-array exemption.
    if row_bytes <= _TARGET_BLOCK_BYTES or WC % 128 != 0 or H % 8 != 0:
        hb = H
    else:
        hb = 8
        for d in range(8, H + 1, 8):
            if H % d == 0 and d * elem_bytes <= _TARGET_BLOCK_BYTES:
                hb = d  # keep the largest divisor that fits

    blk_bytes = hb * elem_bytes
    bb = 1
    for d in range(1, n + 1):
        if n % d:
            continue
        if d * blk_bytes > _TARGET_BLOCK_BYTES:
            continue
        # Keep >= 2 total grid steps (when at all possible) so both v7x cores
        # get work under dimension_semantics=("parallel","parallel").
        if (n // d) * (H // hb) < 2 and n * (H // hb) >= 2:
            continue
        bb = d
    return bb, hb


def _build_tiler(n, H, WC, bb, hb, dtype, single_buffer_input):
    in_kwargs = {}
    if single_buffer_input:
        # The query block index is constant along the inner (batch) axis, so it
        # is never re-fetched; one VMEM buffer is enough.
        in_kwargs["pipeline_mode"] = pl.Buffered(1)

    itemsize = dtype.itemsize
    in_bytes = hb * WC * itemsize
    out_block_bytes = bb * hb * WC * itemsize
    needed = (1 if single_buffer_input else 2) * in_bytes + 2 * out_block_bytes
    # Explicit limit with headroom; stays well under v7x's 64 MiB physical VMEM.
    vmem_limit = int(min(60 << 20, max(8 << 20, 2 * needed)))

    return pl.pallas_call(
        _broadcast_query_kernel,
        out_shape=jax.ShapeDtypeStruct((n, H, WC), dtype),
        grid_spec=pltpu.PrefetchScalarGridSpec(
            num_scalar_prefetch=0,
            grid=(H // hb, n // bb),
            in_specs=[
                pl.BlockSpec((hb, WC), lambda h, i: (h, 0), **in_kwargs),
            ],
            out_specs=pl.BlockSpec((bb, hb, WC), lambda h, i: (i, h, 0)),
        ),
        compiler_params=pltpu.CompilerParams(
            dimension_semantics=("parallel", "parallel"),
            vmem_limit_bytes=vmem_limit,
        ),
    )


_TILER_CACHE = {}


def _get_tiler(n, H, WC, bb, hb, dtype):
    key = (n, H, WC, bb, hb, dtype)
    fn = _TILER_CACHE.get(key)
    if fn is None:
        try:
            fn = _build_tiler(n, H, WC, bb, hb, dtype, single_buffer_input=True)
            # Force trace/compile/run now so an unsupported Buffered(1) is caught.
            jax.block_until_ready(fn(jnp.zeros((H, WC), dtype)))
        except Exception:
            # Fall back to default double buffering on this jax version/backend.
            fn = _build_tiler(n, H, WC, bb, hb, dtype, single_buffer_input=False)
        _TILER_CACHE[key] = fn
    return fn


def _tile_query(query: jax.Array, bs: Tuple[int, ...]) -> jax.Array:
    """Tile `query` of shape (H, W, C) to shape (*bs, H, W, C) with Pallas."""
    H, W, C = query.shape
    n = 1
    for b in bs:
        n *= int(b)
    WC = W * C

    q2d = query.reshape(H, WC)  # contiguous -> free; makes stores lane-dense
    bb, hb = _pick_blocks(n, H, WC, query.dtype.itemsize)
    tiler = _get_tiler(n, H, WC, bb, hb, query.dtype)
    out = tiler(q2d)            # (n, H, WC)
    return out.reshape(*bs, H, W, C)


class Latent2DQueryGenerator:
    """JAX/Pallas port of pointbev.models.bevformer.Latent2DQueryGenerator."""

    def __init__(self, channels: int,
                 bev_shape: Optional[Tuple[int, int]] = None,
                 query_flat_shape: Optional[int] = None, *, key):
        if query_flat_shape is not None:
            query_shape = (query_flat_shape, 1)
        elif bev_shape is not None:
            query_shape = tuple(bev_shape)
        else:
            raise ValueError("Either bev_shape or query_flat_shape must be provided")
        self._query_seq_len = query_shape
        self._output_c = channels
        # deterministic synthetic init: 0.1 * N(0, 1), same shape as torch param
        self.query = 0.1 * jax.random.normal(
            key, (*query_shape, channels), dtype=jnp.float32
        )

    @property
    def query_shape(self):
        return self._query_seq_len

    @property
    def out_c(self):
        return self._output_c

    def __call__(self, bs: List[int]):
        h, w, c = self.query.shape
        query = _tile_query(self.query, tuple(int(b) for b in bs))
        return query, (h, w)


if __name__ == "__main__":
    key = jax.random.PRNGKey(0)

    # --- bev_shape path (main use case) ---
    channels = 32
    bev_shape = (16, 16)
    bs = [2, 3]  # e.g. (batch, time)

    gen = Latent2DQueryGenerator(channels, bev_shape=bev_shape, key=key)
    query_out, (h, w) = gen(bs)
    query_out = jax.block_until_ready(query_out)

    ref = jnp.broadcast_to(gen.query[None, None], (bs[0], bs[1], h, w, channels))
    assert query_out.shape == (bs[0], bs[1], h, w, channels), query_out.shape
    assert query_out.dtype == gen.query.dtype
    assert (h, w) == bev_shape
    assert jnp.array_equal(query_out, ref)

    # --- query_flat_shape path ---
    gen2 = Latent2DQueryGenerator(4, query_flat_shape=8, key=jax.random.PRNGKey(1))
    out2, (h2, w2) = gen2([2])
    out2 = jax.block_until_ready(out2)
    assert out2.shape == (2, 8, 1, 4), out2.shape
    assert (h2, w2) == (8, 1)
    assert jnp.array_equal(out2, jnp.broadcast_to(gen2.query[None], (2, 8, 1, 4)))

    print("KERNEL_OK")
</pallas_src>

<mosaic_0001>
module attributes {stable_mosaic.version = 11 : i64} {
  func.func @_broadcast_query_kernel(%arg0: i32, %arg1: i32, %arg2: memref<16x512xf32, #tpu.memory_space<vmem>>, %arg3: memref<3x16x512xf32, #tpu.memory_space<vmem>>) attributes {dimension_semantics = [#tpu.dimension_semantics<parallel>, #tpu.dimension_semantics<parallel>], iteration_bounds = array<i64: 1, 2>, scalar_prefetch = 0 : i64, scratch_operands = 0 : i64, tpu.core_type = #tpu.core_type<tc>, window_params = [{pipeline_mode = #tpu.pipeline_mode<synchronous>, transform_indices = @transform_0, window_bounds = array<i64: 16, 512>}, {transform_indices = @transform_1, window_bounds = array<i64: 3, 16, 512>}]} {
    %c0 = arith.constant 0 : index
    %c0_0 = arith.constant 0 : index
    %0 = vector.load %arg2[%c0, %c0_0] : memref<16x512xf32, #tpu.memory_space<vmem>>, vector<16x512xf32>
    %c0_1 = arith.constant 0 : index
    %c0_2 = arith.constant 0 : index
    %c0_3 = arith.constant 0 : index
    %1 = vector.load %arg3[%c0_1, %c0_2, %c0_3] : memref<3x16x512xf32, #tpu.memory_space<vmem>>, vector<1x16x512xf32>
    %2 = vector.shape_cast %1 : vector<1x16x512xf32> to vector<16x512xf32>
    %3 = vector.shape_cast %0 : vector<16x512xf32> to vector<1x16x512xf32>
    tpu.vector_store %arg3[%c0_1, %c0_2, %c0_3], %3 {strides = array<i32>} : memref<3x16x512xf32, #tpu.memory_space<vmem>>, vector<1x16x512xf32>,
    %c1 = arith.constant 1 : index
    %c0_4 = arith.constant 0 : index
    %c0_5 = arith.constant 0 : index
    %4 = vector.load %arg3[%c1, %c0_4, %c0_5] : memref<3x16x512xf32, #tpu.memory_space<vmem>>, vector<1x16x512xf32>
    %5 = vector.shape_cast %4 : vector<1x16x512xf32> to vector<16x512xf32>
    %6 = vector.shape_cast %0 : vector<16x512xf32> to vector<1x16x512xf32>
    tpu.vector_store %arg3[%c1, %c0_4, %c0_5], %6 {strides = array<i32>} : memref<3x16x512xf32, #tpu.memory_space<vmem>>, vector<1x16x512xf32>,
    %c2 = arith.constant 2 : index
    %c0_6 = arith.constant 0 : index
    %c0_7 = arith.constant 0 : index
    %7 = vector.load %arg3[%c2, %c0_6, %c0_7] : memref<3x16x512xf32, #tpu.memory_space<vmem>>, vector<1x16x512xf32>
    %8 = vector.shape_cast %7 : vector<1x16x512xf32> to vector<16x512xf32>
    %9 = vector.shape_cast %0 : vector<16x512xf32> to vector<1x16x512xf32>
    tpu.vector_store %arg3[%c2, %c0_6, %c0_7], %9 {strides = array<i32>} : memref<3x16x512xf32, #tpu.memory_space<vmem>>, vector<1x16x512xf32>,
    return
  }
  func.func @transform_0(%arg0: i32, %arg1: i32) -> (i32, i32) {
    %c0_i32 = arith.constant 0 : i32
    %c0_i32_0 = arith.constant 0 : i32
    return %arg0, %c0_i32 : i32, i32
  }
  func.func @transform_1(%arg0: i32, %arg1: i32) -> (i32, i32, i32) {
    %c0_i32 = arith.constant 0 : i32
    %c0_i32_0 = arith.constant 0 : i32
    return %arg1, %arg0, %c0_i32 : i32, i32, i32
  }
}

module attributes {stable_mosaic.version = 11 : i64} {
  func.func @_broadcast_query_kernel(%arg0: i32, %arg1: i32, %arg2: memref<16x512xf32, #tpu.memory_space<vmem>>, %arg3: memref<3x16x512xf32, #tpu.memory_space<vmem>>) attributes {dimension_semantics = [#tpu.dimension_semantics<parallel>, #tpu.dimension_semantics<parallel>], iteration_bounds = array<i64: 1, 2>, scalar_prefetch = 0 : i64, scratch_operands = 0 : i64, tpu.core_type = #tpu.core_type<tc>, window_params = [{transform_indices = @transform_0, window_bounds = array<i64: 16, 512>}, {transform_indices = @transform_1, window_bounds = array<i64: 3, 16, 512>}]} {
    %c0 = arith.constant 0 : index
    %c0_0 = arith.constant 0 : index
    %0 = vector.load %arg2[%c0, %c0_0] : memref<16x512xf32, #tpu.memory_space<vmem>>, vector<16x512xf32>
    %c0_1 = arith.constant 0 : index
    %c0_2 = arith.constant 0 : index
    %c0_3 = arith.constant 0 : index
    %1 = vector.load %arg3[%c0_1, %c0_2, %c0_3] : memref<3x16x512xf32, #tpu.memory_space<vmem>>, vector<1x16x512xf32>
    %2 = vector.shape_cast %1 : vector<1x16x512xf32> to vector<16x512xf32>
    %3 = vector.shape_cast %0 : vector<16x512xf32> to vector<1x16x512xf32>
    tpu.vector_store %arg3[%c0_1, %c0_2, %c0_3], %3 {strides = array<i32>} : memref<3x16x512xf32, #tpu.memory_space<vmem>>, vector<1x16x512xf32>,
    %c1 = arith.constant 1 : index
    %c0_4 = arith.constant 0 : index
    %c0_5 = arith.constant 0 : index
    %4 = vector.load %arg3[%c1, %c0_4, %c0_5] : memref<3x16x512xf32, #tpu.memory_space<vmem>>, vector<1x16x512xf32>
    %5 = vector.shape_cast %4 : vector<1x16x512xf32> to vector<16x512xf32>
    %6 = vector.shape_cast %0 : vector<16x512xf32> to vector<1x16x512xf32>
    tpu.vector_store %arg3[%c1, %c0_4, %c0_5], %6 {strides = array<i32>} : memref<3x16x512xf32, #tpu.memory_space<vmem>>, vector<1x16x512xf32>,
    %c2 = arith.constant 2 : index
    %c0_6 = arith.constant 0 : index
    %c0_7 = arith.constant 0 : index
    %7 = vector.load %arg3[%c2, %c0_6, %c0_7] : memref<3x16x512xf32, #tpu.memory_space<vmem>>, vector<1x16x512xf32>
    %8 = vector.shape_cast %7 : vector<1x16x512xf32> to vector<16x512xf32>
    %9 = vector.shape_cast %0 : vector<16x512xf32> to vector<1x16x512xf32>
    tpu.vector_store %arg3[%c2, %c0_6, %c0_7], %9 {strides = array<i32>} : memref<3x16x512xf32, #tpu.memory_space<vmem>>, vector<1x16x512xf32>,
    return
  }
  func.func @transform_0(%arg0: i32, %arg1: i32) -> (i32, i32) {
    %c0_i32 = arith.constant 0 : i32
    %c0_i32_0 = arith.constant 0 : i32
    return %arg0, %c0_i32 : i32, i32
  }
  func.func @transform_1(%arg0: i32, %arg1: i32) -> (i32, i32, i32) {
    %c0_i32 = arith.constant 0 : i32
    %c0_i32_0 = arith.constant 0 : i32
    return %arg1, %arg0, %c0_i32 : i32, i32, i32
  }
}

</mosaic_0001>

<bundles_post_ra>
// kernel: tpu_custom_call.1
= control target key start
LH: loop header
LB: loop body
LE: loop exit
PB: predicated region body
PF: predicated region fallthrough
CT: control target
= control target key end

     0   :  { %6 = vsyncpa [#allocation3], 0  ;;  %s670_s0 = inlined_call_operand.hbm [shape: f32[16,512], index: 0, kind: input, shape index: {}]   ;;  %s671_s1 = inlined_call_operand.hbm [shape: f32[6,16,512], index: 1, kind: output, shape index: {}]  }
   0x1   :  { %7 = vsyncpa [#allocation4], 0 }
   0x2   :  { %9 = vsyncpa [#allocation4 + $0x1], 0  ;;  %s491_s6 = smov 0   ;;  %s493_s7 = smov 0  }
   0x3   :  { %s495_s8 = smov 0   ;;  %s497_s9 = smov 0  }
   0x4   :  { %s499_s10 = smov 0   ;;  %s501_s11 = smov 0  }
   0x5 LB: > { %s263_s12 = sadd.s32 4294967295, %s473_s11   ;;  %s264_s13 = sadd.s32 4294967294, %s473_s11   ;;  %s473_s11 = sphi %s501_s11, %s15_s11   ;;  %s469_s10 = sphi %s499_s10, %s689_s10   ;;  %s465_s9 = sphi %s497_s9, %s688_s9   ;;  %s461_s8 = sphi %s495_s8, %s687_s8   ;;  %s457_s7 = sphi %s493_s7, %s686_s7   ;;  %s453_s6 = sphi %s491_s6, %s685_s6  }
   0x6   : > { %s24_s14 = sadd.s32 1, %s469_s10  ;;  %s62_s15 = sadd.s32 1, %s461_s8 }
   0x7   : > { %p25_p0 = scmp.ge.s32.totalorder %s24_s14, 2  ;;  %p72_p1 = scmp.ne.s32.totalorder %s461_s8, %s457_s7 }
   0x8   : > { %p73_p2 = scmp.eq.s32.totalorder %s263_s12, 1  ;;  %p78_p3 = scmp.ne.s32.totalorder %s457_s7, %s453_s6 }
   0x9   : > { %s691_s14 = smov (%p25_p0, %s24_s14), 0  ;;  %p79_p5 = scmp.eq.s32.totalorder %s264_s13, 1 }
   0xa   : > { %p531_p4 = por %p73_p2, %p72_p1  ;;  %s57_s17 = ssub.s32 %s469_s10, %s691_s14 }
   0xb   : > { %p265_p6 = scmp.ge.s32.totalorder %s473_s11, 1  ;;  %p60_p7 = scmp.eq.s32.totalorder %s57_s17, 0 }
   0xc   : > { %s676_s16 = scalar_select %p531_p4, 1, 0 }
   0xd   : > { %p538_p8 = por %p79_p5, %p78_p3  ;;  %p86_p9 = scmp.lt.s32.totalorder %s473_s11, 3 }
   0xe   : > { %s544_s19 = scalar_select %p60_p7, %s461_s8, %s62_s15  }
   0xf   : > { %s677_s18 = scalar_select %p538_p8, 1, 0 }
  0x10   : > { %p546_p10 = pnand %p265_p6, %p86_p9  ;;  %p550_p11 = scmp.eq.s32.totalorder %s263_s12, 0 }
  0x11   : > { %s475_s22 = smov [#allocation2]   ;;  %s363_s27 = scalar_lea.hbm %s670_s0, 1024 }
  0x12   : > { %s678_s20 = scalar_select %p546_p10, 1, 0 }
  0x13   : > { %s679_s21 = scalar_select %p550_p11, 1, 0 }
  0x14   : > { %p299_p12 = pneg %p546_p10  ;;  %s102_s23 = sshll.u32 %s475_s22, 4  ;;  %s103_s23 = int_to_ptr.vmem [resolvable:$true] %s102_s23 }
  0x15   : > { %p364_p0 = scmp.ne.s32.totalorder %s670_s0, %s363_s27  ;;  %p370_p5 = scmp.lt.u32.totalorder %s363_s27, %s670_s0 }
  0x16   : > { %p558_p13 = pnand %p550_p11, %p299_p12 }
  0x18   : > { %p365_p1 = pneg %p558_p13 }
  0x1a   : > { %p366_p2 = pnand %p365_p1, %p364_p0 }
  0x1c   : > { %p367_p3 = pneg %p366_p2 }
  0x1e   : > { %p372_p6 = pnand %p370_p5, %p367_p3 }
  0x20   : > { %375 = shalt.err (!%p372_p6)
}
  0x21   : > { %s376_s3 = scalar_lea.vmem %s103_s23, 1024  ;;  %p384_p8 = scmp.lt.s32.totalorder %s103_s23, %s103_s23 }
  0x22   : > { %p377_p7 = scmp.ne.s32.totalorder %s103_s23, %s376_s3  ;;  %p385_p4 = scmp.lt.s32.totalorder %s376_s3, %s376_s3 }
  0x24   : > { %p379_p9 = pnand %p377_p7, %p365_p1  ;;  %p386_p11 = por %p385_p4, %p384_p8 }
  0x26   : > { %p380_p12 = pneg %p379_p9 }
  0x28   : > { %p387_p10 = pnand %p386_p11, %p380_p12 }
  0x2a   : > { %390 = shalt.err (!%p387_p10)
}
  0x2b   : > { %s476_s4 = smov 512   ;;  %s477_s5 = smov 32  }
  0x2c   : > { %302 = dma.hbm_to_vmem [thread:$0]  (!%p558_p13), %s670_s0, 1024, %s103_s23, [#allocation3], %s476_s4, %s476_s4, %s477_s5  }
  0x2d   : > { %p681_p0 = scmp.ne.s32.totalorder %s678_s20, 0 }
  0x2e   : > { %p682_p2 = scmp.ne.s32.totalorder (!%p681_p0), %s679_s21, 0 }
  0x2f   : > { %118 = sbr.rel (%p681_p0) target bundleno = 85 (0x55), region = 24 }
  0x36   : > { %444 = dma.done.wait (%p682_p2), [#allocation3], 1024  }
  0x37   : > { %446 = vsyncadd (%p682_p2), [#allocation3], 4294966272  ;;  %s130_s15 = sand.u32 1, %s457_s7   ;;  %s291_s22 = smul.u32 3072, %s465_s9  ;;  %v136_v0 = vld [vmem:[#allocation2] sm:$0xff]  ;;  %v137_v1 = vld [vmem:[#allocation2 + $0x8] sm:$0xff] }
  0x38   : > { %s292_s17 = smul.u32 192, %s130_s15  ;;  %v138_v2 = vld [vmem:[#allocation2 + $0x10] sm:$0xff]  ;;  %v139_v3 = vld [vmem:[#allocation2 + $0x18] sm:$0xff]  ;;  %v140_v4 = vld [vmem:[#allocation2 + $0x20] sm:$0xff]  ;;  %s624_s25 = scalar_lea.sflag [#allocation4], %s130_s15 }
  0x39   : > { %s594_s9 = scalar_lea.hbm %s671_s1, %s291_s22  ;;  %v141_v5 = vld [vmem:[#allocation2 + $0x28] sm:$0xff]  ;;  %v142_v6 = vld [vmem:[#allocation2 + $0x30] sm:$0xff]  ;;  %v143_v7 = vld [vmem:[#allocation2 + $0x38] sm:$0xff]  ;;  %p683_p8 = scmp.ne.s32.totalorder %s676_s16, 0 }
  0x3a   : > { %s588_s24 = scalar_lea.vmem [#allocation5], %s292_s17  ;;  %s478_s27 = smov [#allocation5]  }
  0x3b   : > { %s188_s20 = sshll.u32 %s588_s24, 4  ;;  %144 = vst [vmem:[%s588_s24] sm:$0xff] %v136_v0  ;;  %269 = vst [vmem:[%s588_s24 + $0x40] sm:$0xff] %v136_v0  ;;  %s395_s28 = sshll.u32 %s478_s27, 4  ;;  %s605_s20 = int_to_ptr.vmem [resolvable:$true] %s188_s20  ;;  %s396_s28 = int_to_ptr.vmem [resolvable:$false] %s395_s28 }
  0x3c   : > { %277 = vst [vmem:[%s588_s24 + $0x80] sm:$0xff] %v136_v0  ;;  %145 = vst [vmem:[%s588_s24 + $0x8] sm:$0xff] %v137_v1  ;;  %s391_s26 = scalar_lea.vmem %s605_s20, 3072  ;;  %s397_s29 = scalar_lea.vmem %s396_s28, 6144 }
  0x3d   : > { %270 = vst [vmem:[%s588_s24 + $0x48] sm:$0xff] %v137_v1  ;;  %278 = vst [vmem:[%s588_s24 + $0x88] sm:$0xff] %v137_v1  ;;  %p392_p4 = scmp.ne.s32.totalorder %s605_s20, %s391_s26  ;;  %p398_p13 = scmp.lt.s32.totalorder %s605_s20, %s396_s28 }
  0x3e   : > { %146 = vst [vmem:[%s588_s24 + $0x10] sm:$0xff] %v138_v2  ;;  %271 = vst [vmem:[%s588_s24 + $0x50] sm:$0xff] %v138_v2  ;;  %p399_p1 = scmp.lt.s32.totalorder %s397_s29, %s391_s26 }
  0x3f   : > { %279 = vst [vmem:[%s588_s24 + $0x90] sm:$0xff] %v138_v2  ;;  %147 = vst [vmem:[%s588_s24 + $0x18] sm:$0xff] %v139_v3  ;;  %p393_p10 = pnand %p392_p4, %p683_p8 }
  0x40   : > { %272 = vst [vmem:[%s588_s24 + $0x58] sm:$0xff] %v139_v3  ;;  %280 = vst [vmem:[%s588_s24 + $0x98] sm:$0xff] %v139_v3  ;;  %p400_p3 = por %p399_p1, %p398_p13 }
  0x41   : > { %148 = vst [vmem:[%s588_s24 + $0x20] sm:$0xff] %v140_v4  ;;  %273 = vst [vmem:[%s588_s24 + $0x60] sm:$0xff] %v140_v4  ;;  %p394_p11 = pneg %p393_p10 }
  0x42   : > { %281 = vst [vmem:[%s588_s24 + $0xa0] sm:$0xff] %v140_v4  ;;  %149 = vst [vmem:[%s588_s24 + $0x28] sm:$0xff] %v141_v5 }
  0x43   : > { %274 = vst [vmem:[%s588_s24 + $0x68] sm:$0xff] %v141_v5  ;;  %282 = vst [vmem:[%s588_s24 + $0xa8] sm:$0xff] %v141_v5  ;;  %p401_p5 = pnand %p400_p3, %p394_p11 }
  0x44   : > { %150 = vst [vmem:[%s588_s24 + $0x30] sm:$0xff] %v142_v6  ;;  %275 = vst [vmem:[%s588_s24 + $0x70] sm:$0xff] %v142_v6 }
  0x45   : > { %283 = vst [vmem:[%s588_s24 + $0xb0] sm:$0xff] %v142_v6  ;;  %151 = vst [vmem:[%s588_s24 + $0x38] sm:$0xff] %v143_v7 }
  0x46   : > { %276 = vst [vmem:[%s588_s24 + $0x78] sm:$0xff] %v143_v7  ;;  %284 = vst [vmem:[%s588_s24 + $0xb8] sm:$0xff] %v143_v7 }
  0x47   : > { %404 = shalt.err (!%p401_p5)
}
  0x48   : > { %s405_s30 = scalar_lea.hbm %s594_s9, 3072  ;;  %s409_s4 = scalar_lea.hbm %s671_s1, 6144 }
  0x49   : > { %p406_p6 = scmp.ne.s32.totalorder %s594_s9, %s405_s30  ;;  %p410_p12 = scmp.lt.u32.totalorder %s594_s9, %s671_s1 }
  0x4a   : > { %p411_p0 = scmp.lt.u32.totalorder %s409_s4, %s405_s30  ;;  %p413_p4 = scmp.lt.u32.totalorder %s405_s30, %s594_s9 }
  0x4b   : > { %p407_p7 = pnand %p406_p6, %p683_p8 }
  0x4c   : > { %p412_p2 = por %p411_p0, %p410_p12 }
  0x4d   : > { %p408_p9 = pneg %p407_p7 }
  0x4e   : > { %p414_p10 = por %p413_p4, %p412_p2 }
  0x50   : > { %p415_p11 = pnand %p414_p10, %p408_p9 }
  0x52   : > { %418 = shalt.err (!%p415_p11)
}
  0x53   : > { %s479_s13 = smov 512   ;;  %s480_s15 = smov 32  }
  0x54   : > { %297 = dma.vmem_to_hbm [thread:$0]  (%p683_p8), %s605_s20, 3072, %s594_s9, %s624_s25, %s479_s13, %s479_s13, %s480_s15  }
  0x55 PF: > { %p309_p13 = scmp.ge.s32.totalorder %s473_s11, 2  ;;  %s203_s17 = sand.u32 1, %s453_s6  }
  0x56   : > { %p684_p1 = scmp.ne.s32.totalorder %s677_s18, 0  ;;  %s204_s22 = scalar_lea.sflag [#allocation4], %s203_s17 }
  0x58   : > { %p304_p3 = pnand %p309_p13, %p684_p1 }
  0x5a   : > { %448 = dma.done.wait (!%p304_p3), %s204_s22, 3072  }
  0x5b   : > { %450 = vsyncadd (!%p304_p3), %s204_s22, 4294964224  ;;  %s15_s11 = sadd.s32 1, %s473_s11   ;;  %s685_s6 = smov %s457_s7 }
  0x5c   : > { %p12_p5 = scmp.ge.s32.totalorder %s15_s11, 4   ;;  %s686_s7 = smov %s461_s8 }
  0x5d   : > { %s687_s8 = smov %s544_s19  ;;  %s688_s9 = smov %s469_s10 }
  0x5e   : > { %s689_s10 = smov %s691_s14  ;;  %14 = sbr.rel (!%p12_p5) target bundleno = 5 (0x5), region = 64 }
  0x65   :  { %209 = vsyncpa [#allocation3], 1 }
  0x66   :  { %211 = vsyncpa [#allocation3 + $0x1], 1 }
  0x67   :  { %212 = vsyncpa [#allocation4], 1 }
  0x68   :  { %214 = vsyncpa [#allocation4 + $0x1], 1 }

// kernel: tpu_custom_call.1
= control target key start
LH: loop header
LB: loop body
LE: loop exit
PB: predicated region body
PF: predicated region fallthrough
CT: control target
= control target key end

     0   :  { %6 = vsyncpa [#allocation3], 0  ;;  %s670_s0 = inlined_call_operand.hbm [shape: f32[16,512], index: 0, kind: input, shape index: {}]   ;;  %s671_s1 = inlined_call_operand.hbm [shape: f32[6,16,512], index: 1, kind: output, shape index: {}]  }
   0x1   :  { %7 = vsyncpa [#allocation4], 0 }
   0x2   :  { %9 = vsyncpa [#allocation4 + $0x1], 0  ;;  %s491_s6 = smov 0   ;;  %s493_s7 = smov 0  }
   0x3   :  { %s495_s8 = smov 0   ;;  %s497_s9 = smov 0  }
   0x4   :  { %s499_s10 = smov 0   ;;  %s501_s11 = smov 0  }
   0x5 LB: > { %s263_s12 = sadd.s32 4294967295, %s473_s11   ;;  %s264_s13 = sadd.s32 4294967294, %s473_s11   ;;  %s473_s11 = sphi %s501_s11, %s15_s11   ;;  %s469_s10 = sphi %s499_s10, %s689_s10   ;;  %s465_s9 = sphi %s497_s9, %s688_s9   ;;  %s461_s8 = sphi %s495_s8, %s687_s8   ;;  %s457_s7 = sphi %s493_s7, %s686_s7   ;;  %s453_s6 = sphi %s491_s6, %s685_s6  }
   0x6   : > { %s24_s14 = sadd.s32 1, %s469_s10  ;;  %s62_s15 = sadd.s32 1, %s461_s8 }
   0x7   : > { %p25_p0 = scmp.ge.s32.totalorder %s24_s14, 2  ;;  %p72_p1 = scmp.ne.s32.totalorder %s461_s8, %s457_s7 }
   0x8   : > { %p73_p2 = scmp.eq.s32.totalorder %s263_s12, 1  ;;  %p78_p3 = scmp.ne.s32.totalorder %s457_s7, %s453_s6 }
   0x9   : > { %s691_s14 = smov (%p25_p0, %s24_s14), 0  ;;  %p79_p5 = scmp.eq.s32.totalorder %s264_s13, 1 }
   0xa   : > { %p531_p4 = por %p73_p2, %p72_p1  ;;  %s57_s17 = ssub.s32 %s469_s10, %s691_s14 }
   0xb   : > { %p265_p6 = scmp.ge.s32.totalorder %s473_s11, 1  ;;  %p60_p7 = scmp.eq.s32.totalorder %s57_s17, 0 }
   0xc   : > { %s676_s16 = scalar_select %p531_p4, 1, 0 }
   0xd   : > { %p538_p8 = por %p79_p5, %p78_p3  ;;  %p86_p9 = scmp.lt.s32.totalorder %s473_s11, 3 }
   0xe   : > { %s544_s19 = scalar_select %p60_p7, %s461_s8, %s62_s15  }
   0xf   : > { %s677_s18 = scalar_select %p538_p8, 1, 0 }
  0x10   : > { %p546_p10 = pnand %p265_p6, %p86_p9  ;;  %p550_p11 = scmp.eq.s32.totalorder %s263_s12, 0 }
  0x11   : > { %s475_s22 = smov [#allocation2]   ;;  %s363_s27 = scalar_lea.hbm %s670_s0, 1024 }
  0x12   : > { %s678_s20 = scalar_select %p546_p10, 1, 0 }
  0x13   : > { %s679_s21 = scalar_select %p550_p11, 1, 0 }
  0x14   : > { %p299_p12 = pneg %p546_p10  ;;  %s102_s23 = sshll.u32 %s475_s22, 4  ;;  %s103_s23 = int_to_ptr.vmem [resolvable:$true] %s102_s23 }
  0x15   : > { %p364_p0 = scmp.ne.s32.totalorder %s670_s0, %s363_s27  ;;  %p370_p5 = scmp.lt.u32.totalorder %s363_s27, %s670_s0 }
  0x16   : > { %p558_p13 = pnand %p550_p11, %p299_p12 }
  0x18   : > { %p365_p1 = pneg %p558_p13 }
  0x1a   : > { %p366_p2 = pnand %p365_p1, %p364_p0 }
  0x1c   : > { %p367_p3 = pneg %p366_p2 }
  0x1e   : > { %p372_p6 = pnand %p370_p5, %p367_p3 }
  0x20   : > { %375 = shalt.err (!%p372_p6)
}
  0x21   : > { %s376_s3 = scalar_lea.vmem %s103_s23, 1024  ;;  %p384_p8 = scmp.lt.s32.totalorder %s103_s23, %s103_s23 }
  0x22   : > { %p377_p7 = scmp.ne.s32.totalorder %s103_s23, %s376_s3  ;;  %p385_p4 = scmp.lt.s32.totalorder %s376_s3, %s376_s3 }
  0x24   : > { %p379_p9 = pnand %p377_p7, %p365_p1  ;;  %p386_p11 = por %p385_p4, %p384_p8 }
  0x26   : > { %p380_p12 = pneg %p379_p9 }
  0x28   : > { %p387_p10 = pnand %p386_p11, %p380_p12 }
  0x2a   : > { %390 = shalt.err (!%p387_p10)
}
  0x2b   : > { %s476_s4 = smov 512   ;;  %s477_s5 = smov 32  }
  0x2c   : > { %302 = dma.hbm_to_vmem [thread:$0]  (!%p558_p13), %s670_s0, 1024, %s103_s23, [#allocation3], %s476_s4, %s476_s4, %s477_s5  }
  0x2d   : > { %p681_p0 = scmp.ne.s32.totalorder %s678_s20, 0 }
  0x2e   : > { %p682_p2 = scmp.ne.s32.totalorder (!%p681_p0), %s679_s21, 0 }
  0x2f   : > { %118 = sbr.rel (%p681_p0) target bundleno = 85 (0x55), region = 24 }
  0x36   : > { %444 = dma.done.wait (%p682_p2), [#allocation3], 1024  }
  0x37   : > { %446 = vsyncadd (%p682_p2), [#allocation3], 4294966272  ;;  %s130_s15 = sand.u32 1, %s457_s7   ;;  %s291_s22 = smul.u32 3072, %s465_s9  ;;  %v136_v0 = vld [vmem:[#allocation2] sm:$0xff]  ;;  %v137_v1 = vld [vmem:[#allocation2 + $0x8] sm:$0xff] }
  0x38   : > { %s292_s17 = smul.u32 192, %s130_s15  ;;  %v138_v2 = vld [vmem:[#allocation2 + $0x10] sm:$0xff]  ;;  %v139_v3 = vld [vmem:[#allocation2 + $0x18] sm:$0xff]  ;;  %v140_v4 = vld [vmem:[#allocation2 + $0x20] sm:$0xff]  ;;  %s624_s25 = scalar_lea.sflag [#allocation4], %s130_s15 }
  0x39   : > { %s594_s9 = scalar_lea.hbm %s671_s1, %s291_s22  ;;  %v141_v5 = vld [vmem:[#allocation2 + $0x28] sm:$0xff]  ;;  %v142_v6 = vld [vmem:[#allocation2 + $0x30] sm:$0xff]  ;;  %v143_v7 = vld [vmem:[#allocation2 + $0x38] sm:$0xff]  ;;  %p683_p8 = scmp.ne.s32.totalorder %s676_s16, 0 }
  0x3a   : > { %s588_s24 = scalar_lea.vmem [#allocation5], %s292_s17  ;;  %s478_s27 = smov [#allocation5]  }
  0x3b   : > { %s188_s20 = sshll.u32 %s588_s24, 4  ;;  %144 = vst [vmem:[%s588_s24] sm:$0xff] %v136_v0  ;;  %269 = vst [vmem:[%s588_s24 + $0x40] sm:$0xff] %v136_v0  ;;  %s395_s28 = sshll.u32 %s478_s27, 4  ;;  %s605_s20 = int_to_ptr.vmem [resolvable:$true] %s188_s20  ;;  %s396_s28 = int_to_ptr.vmem [resolvable:$false] %s395_s28 }
  0x3c   : > { %277 = vst [vmem:[%s588_s24 + $0x80] sm:$0xff] %v136_v0  ;;  %145 = vst [vmem:[%s588_s24 + $0x8] sm:$0xff] %v137_v1  ;;  %s391_s26 = scalar_lea.vmem %s605_s20, 3072  ;;  %s397_s29 = scalar_lea.vmem %s396_s28, 6144 }
  0x3d   : > { %270 = vst [vmem:[%s588_s24 + $0x48] sm:$0xff] %v137_v1  ;;  %278 = vst [vmem:[%s588_s24 + $0x88] sm:$0xff] %v137_v1  ;;  %p392_p4 = scmp.ne.s32.totalorder %s605_s20, %s391_s26  ;;  %p398_p13 = scmp.lt.s32.totalorder %s605_s20, %s396_s28 }
  0x3e   : > { %146 = vst [vmem:[%s588_s24 + $0x10] sm:$0xff] %v138_v2  ;;  %271 = vst [vmem:[%s588_s24 + $0x50] sm:$0xff] %v138_v2  ;;  %p399_p1 = scmp.lt.s32.totalorder %s397_s29, %s391_s26 }
  0x3f   : > { %279 = vst [vmem:[%s588_s24 + $0x90] sm:$0xff] %v138_v2  ;;  %147 = vst [vmem:[%s588_s24 + $0x18] sm:$0xff] %v139_v3  ;;  %p393_p10 = pnand %p392_p4, %p683_p8 }
  0x40   : > { %272 = vst [vmem:[%s588_s24 + $0x58] sm:$0xff] %v139_v3  ;;  %280 = vst [vmem:[%s588_s24 + $0x98] sm:$0xff] %v139_v3  ;;  %p400_p3 = por %p399_p1, %p398_p13 }
  0x41   : > { %148 = vst [vmem:[%s588_s24 + $0x20] sm:$0xff] %v140_v4  ;;  %273 = vst [vmem:[%s588_s24 + $0x60] sm:$0xff] %v140_v4  ;;  %p394_p11 = pneg %p393_p10 }
  0x42   : > { %281 = vst [vmem:[%s588_s24 + $0xa0] sm:$0xff] %v140_v4  ;;  %149 = vst [vmem:[%s588_s24 + $0x28] sm:$0xff] %v141_v5 }
  0x43   : > { %274 = vst [vmem:[%s588_s24 + $0x68] sm:$0xff] %v141_v5  ;;  %282 = vst [vmem:[%s588_s24 + $0xa8] sm:$0xff] %v141_v5  ;;  %p401_p5 = pnand %p400_p3, %p394_p11 }
  0x44   : > { %150 = vst [vmem:[%s588_s24 + $0x30] sm:$0xff] %v142_v6  ;;  %275 = vst [vmem:[%s588_s24 + $0x70] sm:$0xff] %v142_v6 }
  0x45   : > { %283 = vst [vmem:[%s588_s24 + $0xb0] sm:$0xff] %v142_v6  ;;  %151 = vst [vmem:[%s588_s24 + $0x38] sm:$0xff] %v143_v7 }
  0x46   : > { %276 = vst [vmem:[%s588_s24 + $0x78] sm:$0xff] %v143_v7  ;;  %284 = vst [vmem:[%s588_s24 + $0xb8] sm:$0xff] %v143_v7 }
  0x47   : > { %404 = shalt.err (!%p401_p5)
}
  0x48   : > { %s405_s30 = scalar_lea.hbm %s594_s9, 3072  ;;  %s409_s4 = scalar_lea.hbm %s671_s1, 6144 }
  0x49   : > { %p406_p6 = scmp.ne.s32.totalorder %s594_s9, %s405_s30  ;;  %p410_p12 = scmp.lt.u32.totalorder %s594_s9, %s671_s1 }
  0x4a   : > { %p411_p0 = scmp.lt.u32.totalorder %s409_s4, %s405_s30  ;;  %p413_p4 = scmp.lt.u32.totalorder %s405_s30, %s594_s9 }
  0x4b   : > { %p407_p7 = pnand %p406_p6, %p683_p8 }
  0x4c   : > { %p412_p2 = por %p411_p0, %p410_p12 }
  0x4d   : > { %p408_p9 = pneg %p407_p7 }
  0x4e   : > { %p414_p10 = por %p413_p4, %p412_p2 }
  0x50   : > { %p415_p11 = pnand %p414_p10, %p408_p9 }
  0x52   : > { %418 = shalt.err (!%p415_p11)
}
  0x53   : > { %s479_s13 = smov 512   ;;  %s480_s15 = smov 32  }
  0x54   : > { %297 = dma.vmem_to_hbm [thread:$0]  (%p683_p8), %s605_s20, 3072, %s594_s9, %s624_s25, %s479_s13, %s479_s13, %s480_s15  }
  0x55 PF: > { %p309_p13 = scmp.ge.s32.totalorder %s473_s11, 2  ;;  %s203_s17 = sand.u32 1, %s453_s6  }
  0x56   : > { %p684_p1 = scmp.ne.s32.totalorder %s677_s18, 0  ;;  %s204_s22 = scalar_lea.sflag [#allocation4], %s203_s17 }
  0x58   : > { %p304_p3 = pnand %p309_p13, %p684_p1 }
  0x5a   : > { %448 = dma.done.wait (!%p304_p3), %s204_s22, 3072  }
  0x5b   : > { %450 = vsyncadd (!%p304_p3), %s204_s22, 4294964224  ;;  %s15_s11 = sadd.s32 1, %s473_s11   ;;  %s685_s6 = smov %s457_s7 }
  0x5c   : > { %p12_p5 = scmp.ge.s32.totalorder %s15_s11, 4   ;;  %s686_s7 = smov %s461_s8 }
  0x5d   : > { %s687_s8 = smov %s544_s19  ;;  %s688_s9 = smov %s469_s10 }
  0x5e   : > { %s689_s10 = smov %s691_s14  ;;  %14 = sbr.rel (!%p12_p5) target bundleno = 5 (0x5), region = 64 }
  0x65   :  { %209 = vsyncpa [#allocation3], 1 }
  0x66   :  { %211 = vsyncpa [#allocation3 + $0x1], 1 }
  0x67   :  { %212 = vsyncpa [#allocation4], 1 }
  0x68   :  { %214 = vsyncpa [#allocation4 + $0x1], 1 }

</bundles_post_ra>
